<compile_context>
chip_gen: v5e
topology: v5e:2x2
jax: 0.10.0
libtpu: 0.0.40
codegen_flags: <defaults>
</compile_context>

<pallas_src>
import functools

import jax
import jax.numpy as jnp
import numpy as np
from jax.experimental import pallas as pl
from jax.experimental.pallas import tpu as pltpu


# MXU operand dtype for the hidden-layer matmuls.  f32 keeps tight parity with the
# f32 reference; on v6e/v7x set to jnp.bfloat16 for full-rate MXU and halved operand
# traffic (accumulation stays f32 via preferred_element_type).  On v5e the cast is
# already restricted to matmul operands only (its VPU/EUP have no bf16).
MXU_DTYPE = jnp.float32


def _harmonic_kernel(x_ref, w_in_ref, b_in_ref, w_mid_ref, b_mid_ref,
                     w_s_ref, b_s_ref, orb_ref, *,
                     tb, n_part, num_hidden, num_mid, mxu_dtype):
    N, H = n_part, num_hidden
    inv_n = 1.0 / N

    # Positions arrive particle-major: x3[n, b, 0] = x0[batch_tile_b, particle_n].
    x3 = x_ref[...]                                        # (N, TB, 1)
    x_col = x3.reshape(N * tb, 1)                          # layout-preserving (tb % 8 == 0)

    # Per-batch mean position: sum the N particle slabs (VPU adds, no pool matmul).
    xmean = x3[0]
    for n in range(1, N):
        xmean = xmean + x3[n]
    xmean = xmean * inv_n                                  # (TB, 1)
    xmean_col = jnp.concatenate([xmean] * N, axis=0)       # (N*TB, 1)

    # InputEquivariantLayer: tanh([x_i, mean_x] @ W + b).  in_features == 2, so two
    # rank-1 VPU broadcasts beat an MXU matmul with K = 2.
    w_in = w_in_ref[...]                                   # (2, H)
    h = jnp.tanh(x_col * w_in[0:1, :] + xmean_col * w_in[1:2, :] + b_in_ref[...])
    # h: (N*TB, H), row (n, b) holds particle n of batch-tile row b.

    # IntermediateEquivariantLayer blocks with residual: h <- tanh([h, mean h] @ W + b) + h
    for i in range(num_mid):                               # num_mid is small: static unroll
        w = w_mid_ref[i]                                   # (2H, H)
        b = b_mid_ref[i]                                   # (1, H)

        # Per-batch particle mean: N aligned (TB, H) slab adds (pure VPU).
        hm = h[0:tb, :]
        for n in range(1, N):
            hm = hm + h[n * tb:(n + 1) * tb, :]
        hm = hm * inv_n                                    # (TB, H)

        # Mean term shared across particles (one small matmul) + one tall matmul for
        # the per-particle term: (N+1) matmul-equivalents instead of 2N, f32 accumulate.
        mean_term = jnp.dot(hm.astype(mxu_dtype), w[H:, :].astype(mxu_dtype),
                            preferred_element_type=jnp.float32)          # (TB, H)
        self_term = jnp.dot(h.astype(mxu_dtype), w[:H, :].astype(mxu_dtype),
                            preferred_element_type=jnp.float32)          # (N*TB, H)
        upd = jnp.tanh(self_term + jnp.concatenate([mean_term] * N, axis=0) + b)
        h = upd + h                                        # residual

    # SLogSlaterDeterminant orbital matrix: one tall (N*TB, H) @ (H, N) MXU matmul.
    orb = jnp.dot(h.astype(mxu_dtype), w_s_ref[...].astype(mxu_dtype),
                  preferred_element_type=jnp.float32) + b_s_ref[...]     # (N*TB, N)
    orb_ref[...] = orb.reshape(N, tb, N)                   # layout-preserving split, full store


def pallas_orbitals(x0, params, *, num_hidden, num_layers):
    """Runs the equivariant network; returns orbital matrices of shape (B, N, N)."""
    B, N = x0.shape
    H = num_hidden
    num_mid = num_layers - 1
    assert num_mid >= 1, "need at least one intermediate layer"

    # Batch tile: sublane aligned (multiple of 8), capped at 512 rows so the per-tile
    # working set (~ N*TB*(2H+N)*4 B of activations + tiny weights) stays well under
    # the 32 MiB scoped / 64 MiB (v7x) VMEM limits with double buffering.
    b_pad = -(-B // 8) * 8
    tb = min(512, b_pad)
    b_pad = -(-b_pad // tb) * tb
    if b_pad != B:
        x0p = jnp.zeros((b_pad, N), jnp.float32).at[:B].set(x0.astype(jnp.float32))
    else:
        x0p = x0.astype(jnp.float32)

    # Particle-major positions: x_pm[n, b, 0] = x0[b, n]  (cheap XLA transpose).
    x_pm = jnp.transpose(x0p, (1, 0))[:, :, None]

    kernel = functools.partial(_harmonic_kernel, tb=tb, n_part=N,
                               num_hidden=H, num_mid=num_mid, mxu_dtype=MXU_DTYPE)

    in_specs = [
        pl.BlockSpec((N, tb, 1), lambda i: (0, i, 0)),            # positions (batch-tiled)
        pl.BlockSpec((2, H), lambda i: (0, 0)),                   # w_in   (resident)
        pl.BlockSpec((1, H), lambda i: (0, 0)),                   # b_in
        pl.BlockSpec((num_mid, 2 * H, H), lambda i: (0, 0, 0)),   # w_mid  (stacked, resident)
        pl.BlockSpec((num_mid, 1, H), lambda i: (0, 0, 0)),       # b_mid
        pl.BlockSpec((H, N), lambda i: (0, 0)),                   # w_s
        pl.BlockSpec((1, N), lambda i: (0, 0)),                   # b_s
    ]
    out_specs = pl.BlockSpec((N, tb, N), lambda i: (0, i, 0))

    orb_pm = pl.pallas_call(
        kernel,
        grid=(b_pad // tb,),
        in_specs=in_specs,
        out_specs=out_specs,
        out_shape=jax.ShapeDtypeStruct((N, b_pad, N), jnp.float32),
        compiler_params=pltpu.CompilerParams(
            dimension_semantics=("parallel",)),   # v7x: shard batch tiles across both TCs
    )(x_pm, params["w_in"], params["b_in"], params["w_mid"], params["b_mid"],
      params["w_s"], params["b_s"])

    # (N, B, N) -> (B, N, N) for slogdet; cheap XLA transpose outside the kernel.
    return jnp.transpose(orb_pm[:, :B, :], (1, 0, 2))


def log_harmonic_net_forward(x0, params, *, num_hidden, num_layers):
    orb = pallas_orbitals(x0, params, num_hidden=num_hidden, num_layers=num_layers)
    # Envelope is O(B*N) trivial work: plain JAX (removed from the kernel per review).
    log_envelope = -params["width"][0] * jnp.sum(x0 * x0, axis=-1)        # (B,)
    # TODO(synk): signed log-determinant (LU with partial pivoting) has no clean Pallas
    # equivalent; it is applied in plain JAX to the kernel-produced orbital matrices.
    sign, logabsdet = jnp.linalg.slogdet(orb)
    return sign, logabsdet + log_envelope


def reference_forward(x0, params, *, num_hidden, num_layers):
    """Pure-JAX reference (mirrors the PyTorch forward semantics), f32-accurate."""
    B, N = x0.shape
    hp = jax.lax.Precision.HIGHEST
    xmean = jnp.mean(x0, axis=1, keepdims=True)
    f = jnp.stack([x0, jnp.broadcast_to(xmean, (B, N))], axis=-1)           # (B,N,2)
    h = jnp.tanh(jnp.einsum('bnf,fh->bnh', f, params["w_in"], precision=hp)
                 + params["b_in"][0])
    for i in range(num_layers - 1):
        hm = jnp.broadcast_to(jnp.mean(h, axis=1, keepdims=True), h.shape)
        g = jnp.concatenate([h, hm], axis=-1)                               # (B,N,2H)
        h = jnp.tanh(jnp.einsum('bng,gh->bnh', g, params["w_mid"][i], precision=hp)
                     + params["b_mid"][i][0]) + h
    orb = jnp.einsum('bnh,hk->bnk', h, params["w_s"], precision=hp) + params["b_s"][0]
    env = -params["width"][0] * jnp.sum(x0 * x0, axis=-1)                   # (B,)
    sign, logabsdet = jnp.linalg.slogdet(orb)
    return sign, logabsdet + env, orb, env


def init_params(key, num_input, num_hidden, num_layers, num_dets):
    assert num_dets == 1, "width broadcasting in the reference forward implies num_dets == 1"
    H = num_hidden
    num_mid = num_layers - 1
    ks = jax.random.split(key, 6)
    return {
        "w_in": 0.5 * jax.random.normal(ks[0], (2, H), jnp.float32),
        "b_in": 0.1 * jax.random.normal(ks[1], (1, H), jnp.float32),
        "w_mid": (0.5 / np.sqrt(2 * H)) * jax.random.normal(ks[2], (num_mid, 2 * H, H), jnp.float32),
        "b_mid": 0.1 * jax.random.normal(ks[3], (num_mid, 1, H), jnp.float32),
        "w_s": (1.0 / np.sqrt(H)) * jax.random.normal(ks[4], (H, num_input), jnp.float32),
        "b_s": 0.1 * jax.random.normal(ks[5], (1, num_input), jnp.float32),
        "width": jnp.full((num_dets,), 0.1, jnp.float32),  # nn.Parameter(empty(num_dets).fill_(0.1))
    }


if __name__ == "__main__":
    B = 8           # batch
    N = 4           # num_input (particles)
    H = 32          # num_hidden
    L = 3           # num_layers (1 input + 2 intermediate)
    D = 1           # num_dets

    key = jax.random.PRNGKey(0)
    kx, kp = jax.random.split(key)
    x0 = jax.random.normal(kx, (B, N), jnp.float32)
    params = init_params(kp, N, H, L, D)

    fwd = jax.jit(functools.partial(log_harmonic_net_forward, num_hidden=H, num_layers=L))
    sign, logpsi = fwd(x0, params)
    jax.block_until_ready((sign, logpsi))

    # Correctness check of the kernel-produced orbitals vs the pure-JAX reference
    # (f32 path, so the tolerance is much tighter than the old 2e-2).
    orb_k = jax.jit(functools.partial(pallas_orbitals, num_hidden=H, num_layers=L))(x0, params)
    _, _, orb_ref, _ = reference_forward(x0, params, num_hidden=H, num_layers=L)
    np.testing.assert_allclose(np.asarray(orb_k), np.asarray(orb_ref), rtol=2e-3, atol=2e-3)

    print("KERNEL_OK")
</pallas_src>

<mosaic_0001>
module attributes {stable_mosaic.version = 11 : i64} {
  func.func @_harmonic_kernel(%arg0: i32, %arg1: memref<4x8x1xf32, #tpu.memory_space<vmem>>, %arg2: memref<2x32xf32, #tpu.memory_space<vmem>>, %arg3: memref<1x32xf32, #tpu.memory_space<vmem>>, %arg4: memref<2x64x32xf32, #tpu.memory_space<vmem>>, %arg5: memref<2x1x32xf32, #tpu.memory_space<vmem>>, %arg6: memref<32x4xf32, #tpu.memory_space<vmem>>, %arg7: memref<1x4xf32, #tpu.memory_space<vmem>>, %arg8: memref<4x8x4xf32, #tpu.memory_space<vmem>>) attributes {dimension_semantics = [#tpu.dimension_semantics<parallel>], iteration_bounds = array<i64: 1>, scalar_prefetch = 0 : i64, scratch_operands = 0 : i64, tpu.core_type = #tpu.core_type<tc>, window_params = [{transform_indices = @transform_0, window_bounds = array<i64: 4, 8, 1>}, {pipeline_mode = #tpu.pipeline_mode<synchronous>, transform_indices = @transform_1, window_bounds = array<i64: 2, 32>}, {pipeline_mode = #tpu.pipeline_mode<synchronous>, transform_indices = @transform_2, window_bounds = array<i64: 1, 32>}, {pipeline_mode = #tpu.pipeline_mode<synchronous>, transform_indices = @transform_3, window_bounds = array<i64: 2, 64, 32>}, {pipeline_mode = #tpu.pipeline_mode<synchronous>, transform_indices = @transform_4, window_bounds = array<i64: 2, 1, 32>}, {pipeline_mode = #tpu.pipeline_mode<synchronous>, transform_indices = @transform_5, window_bounds = array<i64: 32, 4>}, {pipeline_mode = #tpu.pipeline_mode<synchronous>, transform_indices = @transform_6, window_bounds = array<i64: 1, 4>}, {transform_indices = @transform_7, window_bounds = array<i64: 4, 8, 4>}]} {
    %c0 = arith.constant 0 : index
    %c0_0 = arith.constant 0 : index
    %c0_1 = arith.constant 0 : index
    %0 = vector.load %arg1[%c0, %c0_0, %c0_1] : memref<4x8x1xf32, #tpu.memory_space<vmem>>, vector<4x8x1xf32>
    %1 = vector.shape_cast %0 : vector<4x8x1xf32> to vector<32x1xf32>
    %2 = vector.extract_strided_slice %0 {offsets = [0, 0, 0], sizes = [1, 8, 1], strides = [1, 1, 1]} : vector<4x8x1xf32> to vector<1x8x1xf32>
    %3 = vector.shape_cast %2 : vector<1x8x1xf32> to vector<8x1xf32>
    %4 = vector.extract_strided_slice %0 {offsets = [1, 0, 0], sizes = [1, 8, 1], strides = [1, 1, 1]} : vector<4x8x1xf32> to vector<1x8x1xf32>
    %5 = vector.shape_cast %4 : vector<1x8x1xf32> to vector<8x1xf32>
    %6 = arith.addf %3, %5 : vector<8x1xf32>
    %7 = vector.extract_strided_slice %0 {offsets = [2, 0, 0], sizes = [1, 8, 1], strides = [1, 1, 1]} : vector<4x8x1xf32> to vector<1x8x1xf32>
    %8 = vector.shape_cast %7 : vector<1x8x1xf32> to vector<8x1xf32>
    %9 = arith.addf %6, %8 : vector<8x1xf32>
    %10 = vector.extract_strided_slice %0 {offsets = [3, 0, 0], sizes = [1, 8, 1], strides = [1, 1, 1]} : vector<4x8x1xf32> to vector<1x8x1xf32>
    %11 = vector.shape_cast %10 : vector<1x8x1xf32> to vector<8x1xf32>
    %12 = arith.addf %9, %11 : vector<8x1xf32>
    %cst = arith.constant 2.500000e-01 : f32
    %13 = vector.broadcast %cst : f32 to vector<8x1xf32>
    %14 = arith.mulf %12, %13 : vector<8x1xf32>
    %15 = tpu.concatenate %14, %14, %14, %14 in 0 : vector<8x1xf32>, vector<8x1xf32>, vector<8x1xf32>, vector<8x1xf32> -> vector<32x1xf32>
    %c0_2 = arith.constant 0 : index
    %c0_3 = arith.constant 0 : index
    %16 = vector.load %arg2[%c0_2, %c0_3] : memref<2x32xf32, #tpu.memory_space<vmem>>, vector<2x32xf32>
    %17 = vector.extract_strided_slice %16 {offsets = [0, 0], sizes = [1, 32], strides = [1, 1]} : vector<2x32xf32> to vector<1x32xf32>
    %18 = vector.broadcast %1 : vector<32x1xf32> to vector<32x32xf32>
    %19 = vector.broadcast %17 : vector<1x32xf32> to vector<32x32xf32>
    %20 = arith.mulf %18, %19 : vector<32x32xf32>
    %21 = vector.extract_strided_slice %16 {offsets = [1, 0], sizes = [1, 32], strides = [1, 1]} : vector<2x32xf32> to vector<1x32xf32>
    %22 = vector.broadcast %15 : vector<32x1xf32> to vector<32x32xf32>
    %23 = vector.broadcast %21 : vector<1x32xf32> to vector<32x32xf32>
    %24 = arith.mulf %22, %23 : vector<32x32xf32>
    %25 = arith.addf %20, %24 : vector<32x32xf32>
    %c0_4 = arith.constant 0 : index
    %c0_5 = arith.constant 0 : index
    %26 = vector.load %arg3[%c0_4, %c0_5] : memref<1x32xf32, #tpu.memory_space<vmem>>, vector<1x32xf32>
    %27 = vector.broadcast %26 : vector<1x32xf32> to vector<32x32xf32>
    %28 = arith.addf %25, %27 : vector<32x32xf32>
    %29 = math.tanh %28 : vector<32x32xf32>
    %c0_6 = arith.constant 0 : index
    %c0_7 = arith.constant 0 : index
    %c0_8 = arith.constant 0 : index
    %30 = vector.load %arg4[%c0_6, %c0_7, %c0_8] : memref<2x64x32xf32, #tpu.memory_space<vmem>>, vector<1x64x32xf32>
    %31 = vector.shape_cast %30 : vector<1x64x32xf32> to vector<64x32xf32>
    %c0_9 = arith.constant 0 : index
    %c0_10 = arith.constant 0 : index
    %c0_11 = arith.constant 0 : index
    %32 = vector.load %arg5[%c0_9, %c0_10, %c0_11] : memref<2x1x32xf32, #tpu.memory_space<vmem>>, vector<1x1x32xf32>
    %33 = vector.shape_cast %32 : vector<1x1x32xf32> to vector<1x32xf32>
    %34 = vector.extract_strided_slice %29 {offsets = [0, 0], sizes = [8, 32], strides = [1, 1]} : vector<32x32xf32> to vector<8x32xf32>
    %35 = vector.extract_strided_slice %29 {offsets = [8, 0], sizes = [8, 32], strides = [1, 1]} : vector<32x32xf32> to vector<8x32xf32>
    %36 = arith.addf %34, %35 : vector<8x32xf32>
    %37 = vector.extract_strided_slice %29 {offsets = [16, 0], sizes = [8, 32], strides = [1, 1]} : vector<32x32xf32> to vector<8x32xf32>
    %38 = arith.addf %36, %37 : vector<8x32xf32>
    %39 = vector.extract_strided_slice %29 {offsets = [24, 0], sizes = [8, 32], strides = [1, 1]} : vector<32x32xf32> to vector<8x32xf32>
    %40 = arith.addf %38, %39 : vector<8x32xf32>
    %cst_12 = arith.constant 2.500000e-01 : f32
    %41 = vector.broadcast %cst_12 : f32 to vector<8x32xf32>
    %42 = arith.mulf %40, %41 : vector<8x32xf32>
    %43 = vector.extract_strided_slice %31 {offsets = [32, 0], sizes = [32, 32], strides = [1, 1]} : vector<64x32xf32> to vector<32x32xf32>
    %cst_13 = arith.constant dense<0.000000e+00> : vector<8x32xf32>
    %44 = tpu.matmul %42, %43, %cst_13 {dimension_numbers = #tpu.dot_dimension_numbers<[1], [0], [0], [1], [0, 0, 1, 1], [], []>} : vector<8x32xf32>, vector<32x32xf32>, vector<8x32xf32> -> vector<8x32xf32>
    %45 = vector.extract_strided_slice %31 {offsets = [0, 0], sizes = [32, 32], strides = [1, 1]} : vector<64x32xf32> to vector<32x32xf32>
    %cst_14 = arith.constant dense<0.000000e+00> : vector<32x32xf32>
    %46 = tpu.matmul %29, %45, %cst_14 {dimension_numbers = #tpu.dot_dimension_numbers<[1], [0], [0], [1], [0, 0, 1, 1], [], []>} : vector<32x32xf32>, vector<32x32xf32>, vector<32x32xf32> -> vector<32x32xf32>
    %47 = tpu.concatenate %44, %44, %44, %44 in 0 : vector<8x32xf32>, vector<8x32xf32>, vector<8x32xf32>, vector<8x32xf32> -> vector<32x32xf32>
    %48 = arith.addf %46, %47 : vector<32x32xf32>
    %49 = vector.broadcast %33 : vector<1x32xf32> to vector<32x32xf32>
    %50 = arith.addf %48, %49 : vector<32x32xf32>
    %51 = math.tanh %50 : vector<32x32xf32>
    %52 = arith.addf %51, %29 : vector<32x32xf32>
    %c1 = arith.constant 1 : index
    %c0_15 = arith.constant 0 : index
    %c0_16 = arith.constant 0 : index
    %53 = vector.load %arg4[%c1, %c0_15, %c0_16] : memref<2x64x32xf32, #tpu.memory_space<vmem>>, vector<1x64x32xf32>
    %54 = vector.shape_cast %53 : vector<1x64x32xf32> to vector<64x32xf32>
    %c1_17 = arith.constant 1 : index
    %c0_18 = arith.constant 0 : index
    %c0_19 = arith.constant 0 : index
    %55 = vector.load %arg5[%c1_17, %c0_18, %c0_19] : memref<2x1x32xf32, #tpu.memory_space<vmem>>, vector<1x1x32xf32>
    %56 = vector.shape_cast %55 : vector<1x1x32xf32> to vector<1x32xf32>
    %57 = vector.extract_strided_slice %52 {offsets = [0, 0], sizes = [8, 32], strides = [1, 1]} : vector<32x32xf32> to vector<8x32xf32>
    %58 = vector.extract_strided_slice %52 {offsets = [8, 0], sizes = [8, 32], strides = [1, 1]} : vector<32x32xf32> to vector<8x32xf32>
    %59 = arith.addf %57, %58 : vector<8x32xf32>
    %60 = vector.extract_strided_slice %52 {offsets = [16, 0], sizes = [8, 32], strides = [1, 1]} : vector<32x32xf32> to vector<8x32xf32>
    %61 = arith.addf %59, %60 : vector<8x32xf32>
    %62 = vector.extract_strided_slice %52 {offsets = [24, 0], sizes = [8, 32], strides = [1, 1]} : vector<32x32xf32> to vector<8x32xf32>
    %63 = arith.addf %61, %62 : vector<8x32xf32>
    %cst_20 = arith.constant 2.500000e-01 : f32
    %64 = vector.broadcast %cst_20 : f32 to vector<8x32xf32>
    %65 = arith.mulf %63, %64 : vector<8x32xf32>
    %66 = vector.extract_strided_slice %54 {offsets = [32, 0], sizes = [32, 32], strides = [1, 1]} : vector<64x32xf32> to vector<32x32xf32>
    %cst_21 = arith.constant dense<0.000000e+00> : vector<8x32xf32>
    %67 = tpu.matmul %65, %66, %cst_21 {dimension_numbers = #tpu.dot_dimension_numbers<[1], [0], [0], [1], [0, 0, 1, 1], [], []>} : vector<8x32xf32>, vector<32x32xf32>, vector<8x32xf32> -> vector<8x32xf32>
    %68 = vector.extract_strided_slice %54 {offsets = [0, 0], sizes = [32, 32], strides = [1, 1]} : vector<64x32xf32> to vector<32x32xf32>
    %cst_22 = arith.constant dense<0.000000e+00> : vector<32x32xf32>
    %69 = tpu.matmul %52, %68, %cst_22 {dimension_numbers = #tpu.dot_dimension_numbers<[1], [0], [0], [1], [0, 0, 1, 1], [], []>} : vector<32x32xf32>, vector<32x32xf32>, vector<32x32xf32> -> vector<32x32xf32>
    %70 = tpu.concatenate %67, %67, %67, %67 in 0 : vector<8x32xf32>, vector<8x32xf32>, vector<8x32xf32>, vector<8x32xf32> -> vector<32x32xf32>
    %71 = arith.addf %69, %70 : vector<32x32xf32>
    %72 = vector.broadcast %56 : vector<1x32xf32> to vector<32x32xf32>
    %73 = arith.addf %71, %72 : vector<32x32xf32>
    %74 = math.tanh %73 : vector<32x32xf32>
    %75 = arith.addf %74, %52 : vector<32x32xf32>
    %c0_23 = arith.constant 0 : index
    %c0_24 = arith.constant 0 : index
    %76 = vector.load %arg6[%c0_23, %c0_24] : memref<32x4xf32, #tpu.memory_space<vmem>>, vector<32x4xf32>
    %cst_25 = arith.constant dense<0.000000e+00> : vector<32x4xf32>
    %77 = tpu.matmul %75, %76, %cst_25 {dimension_numbers = #tpu.dot_dimension_numbers<[1], [0], [0], [1], [0, 0, 1, 1], [], []>} : vector<32x32xf32>, vector<32x4xf32>, vector<32x4xf32> -> vector<32x4xf32>
    %c0_26 = arith.constant 0 : index
    %c0_27 = arith.constant 0 : index
    %78 = vector.load %arg7[%c0_26, %c0_27] : memref<1x4xf32, #tpu.memory_space<vmem>>, vector<1x4xf32>
    %79 = vector.broadcast %78 : vector<1x4xf32> to vector<32x4xf32>
    %80 = arith.addf %77, %79 : vector<32x4xf32>
    %81 = vector.shape_cast %80 : vector<32x4xf32> to vector<4x8x4xf32>
    %c0_28 = arith.constant 0 : index
    %c0_29 = arith.constant 0 : index
    %c0_30 = arith.constant 0 : index
    %82 = vector.load %arg8[%c0_28, %c0_29, %c0_30] : memref<4x8x4xf32, #tpu.memory_space<vmem>>, vector<4x8x4xf32>
    tpu.vector_store %arg8[%c0_28, %c0_29, %c0_30], %81 {strides = array<i32>} : memref<4x8x4xf32, #tpu.memory_space<vmem>>, vector<4x8x4xf32>,
    return
  }
  func.func @transform_0(%arg0: i32) -> (i32, i32, i32) {
    %c0_i32 = arith.constant 0 : i32
    %c0_i32_0 = arith.constant 0 : i32
    %c0_i32_1 = arith.constant 0 : i32
    return %c0_i32, %arg0, %c0_i32_0 : i32, i32, i32
  }
  func.func @transform_1(%arg0: i32) -> (i32, i32) {
    %c0_i32 = arith.constant 0 : i32
    %c0_i32_0 = arith.constant 0 : i32
    %c0_i32_1 = arith.constant 0 : i32
    return %c0_i32, %c0_i32_0 : i32, i32
  }
  func.func @transform_2(%arg0: i32) -> (i32, i32) {
    %c0_i32 = arith.constant 0 : i32
    %c0_i32_0 = arith.constant 0 : i32
    %c0_i32_1 = arith.constant 0 : i32
    return %c0_i32, %c0_i32_0 : i32, i32
  }
  func.func @transform_3(%arg0: i32) -> (i32, i32, i32) {
    %c0_i32 = arith.constant 0 : i32
    %c0_i32_0 = arith.constant 0 : i32
    %c0_i32_1 = arith.constant 0 : i32
    %c0_i32_2 = arith.constant 0 : i32
    return %c0_i32, %c0_i32_0, %c0_i32_1 : i32, i32, i32
  }
  func.func @transform_4(%arg0: i32) -> (i32, i32, i32) {
    %c0_i32 = arith.constant 0 : i32
    %c0_i32_0 = arith.constant 0 : i32
    %c0_i32_1 = arith.constant 0 : i32
    %c0_i32_2 = arith.constant 0 : i32
    return %c0_i32, %c0_i32_0, %c0_i32_1 : i32, i32, i32
  }
  func.func @transform_5(%arg0: i32) -> (i32, i32) {
    %c0_i32 = arith.constant 0 : i32
    %c0_i32_0 = arith.constant 0 : i32
    %c0_i32_1 = arith.constant 0 : i32
    return %c0_i32, %c0_i32_0 : i32, i32
  }
  func.func @transform_6(%arg0: i32) -> (i32, i32) {
    %c0_i32 = arith.constant 0 : i32
    %c0_i32_0 = arith.constant 0 : i32
    %c0_i32_1 = arith.constant 0 : i32
    return %c0_i32, %c0_i32_0 : i32, i32
  }
  func.func @transform_7(%arg0: i32) -> (i32, i32, i32) {
    %c0_i32 = arith.constant 0 : i32
    %c0_i32_0 = arith.constant 0 : i32
    %c0_i32_1 = arith.constant 0 : i32
    return %c0_i32, %arg0, %c0_i32_0 : i32, i32, i32
  }
}

</mosaic_0001>

<bundles_post_ra>
// kernel: custom-call.2
= control target key start
LH: loop header
LB: loop body
LE: loop exit
PB: predicated region body
PF: predicated region fallthrough
CT: control target
= control target key end

     0   :  { %5 = vsyncpa [#allocation6], 0  ;;  %s893_s0 = inlined_call_operand.vmem [shape: f32[8,4,4], index: 0, kind: input, shape index: {}]   ;;  %s894_s1 = inlined_call_operand.vmem [shape: f32[8,4,4], index: 1, kind: output, shape index: {0}]   ;;  %s895_s2 = inlined_call_operand.vmem [shape: s32[8,4], index: 2, kind: output, shape index: {1}]   ;;  %s896_s3 = inlined_call_operand.hbm [shape: s32[8,4], index: 3, kind: output, shape index: {2}]  }
   0x1   :  { %7 = vsyncpa [#allocation6 + $0x1], 0  ;;  %s723_s12 = smov 0   ;;  %s725_s13 = smov 0  }
   0x2   :  { %s727_s14 = smov 0   ;;  %s729_s15 = smov 0  }
   0x3 LB: > { %s744_s16 = sadd.s32 4294967295, %s696_s15   ;;  %s559_s17 = sadd.s32 4294967294, %s696_s15   ;;  %s696_s15 = sphi %s729_s15, %s902_s15   ;;  %s692_s14 = sphi %s727_s14, %s901_s14   ;;  %s688_s13 = sphi %s725_s13, %s900_s13   ;;  %s684_s12 = sphi %s723_s12, %s899_s12  }
   0x4   : > { %s748_s18 = sadd.s32 1, %s696_s15   ;;  %s17_s19 = sshrl.u32 %s696_s15, 3 }
   0x5   : > { %s18_s20 = sshrl.u32 %s748_s18, 3  ;;  %s22_s21 = sadd.s32 1, %s692_s14 }
   0x6   : > { %s19_s22 = ssub.s32 %s17_s19, %s18_s20  ;;  %p32_p0 = scmp.ne.s32.totalorder %s692_s14, %s688_s13 }
   0x7   : > { %p20_p1 = scmp.eq.s32.totalorder %s19_s22, 0  ;;  %p33_p2 = scmp.eq.s32.totalorder %s744_s16, 7 }
   0x8   : > { %p66_p3 = scmp.ne.s32.totalorder %s688_s13, %s684_s12  ;;  %p67_p4 = scmp.eq.s32.totalorder %s559_s17, 7 }
   0x9   : > { %s759_s23 = scalar_select %p20_p1, %s692_s14, %s22_s21  }
   0xa   : > { %p761_p5 = por %p33_p2, %p32_p0  ;;  %p765_p6 = por %p67_p4, %p66_p3 }
   0xb   : > { %p561_p7 = scmp.ge.s32.totalorder %s696_s15, 8 }
   0xc   : > { %s85_s26 = sand.u32 (!%p561_p7), 1, %s696_s15   ;;  %s563_s27 = sshll.u32 (!%p561_p7), %s696_s15, 2 }
   0xd   : > { %83 = sbr.rel (%p561_p7) target bundleno = 20 (0x14), region = 16  ;;  %s562_s28 = sshll.u32 (!%p561_p7), %s85_s26, 2 }
   0xe   : > { %s89_s4 = scalar_lea.vmem (!%p561_p7), %s893_s0, %s563_s27  ;;  %s87_s5 = scalar_lea.vmem (!%p561_p7), [#allocation1], %s562_s28 }
  0x12   : > { %v106_v0 = vld [vmem:[%s89_s4] sm:$0xf] }
  0x13   : > { %107 = vst [vmem:[%s87_s5] sm:$0xf] %v106_v0 }
  0x14 PF: > { %p564_p8 = scmp.ge.s32.totalorder %s696_s15, 1  ;;  %p124_p9 = scmp.lt.s32.totalorder %s696_s15, 9 }
  0x16   : > { %p125_p10 = pnand %p564_p8, %p124_p9 }
  0x18   : > { %128 = sbr.rel (%p125_p10) target bundleno = 484 (0x1e4), region = 50 }
  0x1d   : > { %s135_s6 = sand.u32 1, %s744_s16   ;;  %s145_s7 = sand.u32 1, %s688_s13   ;;  %v168_v1 = vlaneseq  ;;  %v702_v4 = vmov 0  }
  0x1e   : > { %s779_s8 = sshll.u32 %s135_s6, 2  ;;  %s783_s9 = sshll.u32 %s145_s7, 3 }
  0x1f   : > { %v786_v2 = vshrl.u32 %v168_v1, 7  ;;  %s137_s10 = scalar_lea.vmem [#allocation1], %s779_s8  ;;  %s163_s11 = sand.u32 7, %s744_s16  }
  0x20   : > { %v157_v3 = vld [vmem:[%s137_s10] sm:$0xf]  ;;  %s147_s17 = scalar_lea.vmem [#allocation4], %s783_s9  ;;  %s154_s20 = scalar_lea.vmem [#allocation5], %s783_s9 }
  0x21   : > { %158 = vst [vmem:[#allocation0] sm:$0xf] %v157_v3  ;;  %s793_s19 = scalar_lea.vmem %s147_s17, %s163_s11 [#allocation4]  ;;  %s798_s21 = scalar_lea.vmem %s154_s20, %s163_s11 [#allocation5] }
  0x22   : > { %172 = vst [vmem:[#allocation7] sm:$0xff] %v786_v2  ;;  %s141_s22 = scalar_lea.vmem [#allocation3], %s779_s8  ;;  %s803_s26 = smov 0  }
  0x23   : > { %167 = vst [vmem:[%s793_s19] sm:$0x1] %v702_v4 }
  0x28   : > { %v161_v5 = vld [vmem:[#allocation0] sm:$0xff] }
  0x29   : > { %162 = vst [vmem:[#allocation2] sm:$0xff] %v161_v5 }
  0x2a LB: >> { %vm188_vm0 = vcmp.lt.s32.totalorder %v786_v2, 4  ;;  %v810_v8 = vstv %s700_s26  ;;  %s229_s27 = ssub.s32 128, %s700_s26  ;;  %v235_v39 = vand.u32 127, %v168_v1  ;;  %s241_s28 = scalar_lea.vmem [#allocation2], %s700_s26  ;;  %v238_v42 = vld [vmem:[%s793_s19] ss:$0 sm:$0xff]  ;;  %s700_s26 = sphi %s803_s26, %s178_s26  }
  0x2b   : >> { %vm187_vm1 = vcmp.ge.s32.totalorder %v786_v2, %v810_v8  ;;  %s247_s4 = scalar_lea.vmem [#allocation7], %s700_s26  ;;  %vm267_vm14 = vcmp.gt.s32.totalorder %v786_v2, %v810_v8  ;;  %s178_s26 = sadd.s32 1, %s700_s26  }
  0x2c   : >> { %vm189_vm3 = vmand %vm187_vm1, %vm188_vm0  ;;  %vm236_vm12 = vcmp.eq.s32.totalorder %v235_v39, %v810_v8  ;;  %v249_v44 = vld [vmem:[%s247_s4] ss:$0 sm:$0xff]  ;;  %p175_p11 = scmp.ge.s32.totalorder %s178_s26, 4  }
  0x2d   : > { %s573_s6 = sshll.u32 (%p175_p11), %s744_s16, 2 }
  0x30   : >> { %v183_v6 = vld [vmem:[#allocation2] sm:$0xff]  ;;  %v243_v40 = vld [vmem:[%s241_s28] ss:$0 sm:$0xff] }
  0x31   : >> { %v184_v7 = vand.u32 2147483647, %v183_v6 }
  0x33   : >> { %vm569_vm2 = vcmp.gt.f32.partialorder %v184_v7, -inf }
  0x34   : >> { %vm191_vm4 = vmand %vm189_vm3, %vm569_vm2 }
  0x35   : >> { %v192_v9 = vsel %vm191_vm4, %v786_v2, %v810_v8  ;;  %v193_v10 = vsel %vm191_vm4, %v184_v7, -inf  ;;  %vm284_vm4 = vmand %vm267_vm14, %vm236_vm12 }
  0x36   : >> { %v194_v11 = vrot.slane %v193_v10, 1  ;;  %v195_v12 = vrot.slane %v192_v9, 1 }
  0x38   : >> { %vm196_vm5 = vcmp.ge.f32.partialorder %v194_v11, %v193_v10  ;;  %v199_v13 = vrot.slane %v194_v11, 1  ;;  %v200_v14 = vrot.slane %v195_v12, 1 }
  0x39   : >> { %v197_v15 = vsel %vm196_vm5, %v194_v11, %v193_v10  ;;  %v198_v16 = vsel %vm196_vm5, %v195_v12, %v192_v9  ;;  %vm259_vm5 = vcmp.gt.s32.totalorder %v235_v39, %v810_v8 }
  0x3a   : >> { %vm201_vm6 = vcmp.ge.f32.partialorder %v199_v13, %v197_v15  ;;  %v204_v17 = vrot.slane %v199_v13, 1  ;;  %v205_v18 = vrot.slane %v200_v14, 1 }
  0x3b   : >> { %v202_v19 = vsel %vm201_vm6, %v199_v13, %v197_v15  ;;  %v203_v20 = vsel %vm201_vm6, %v200_v14, %v198_v16 }
  0x3c   : >> { %vm206_vm7 = vcmp.ge.f32.partialorder %v204_v17, %v202_v19  ;;  %v209_v21 = vrot.slane %v204_v17, 1  ;;  %v210_v22 = vrot.slane %v205_v18, 1 }
  0x3d   : >> { %v207_v23 = vsel %vm206_vm7, %v204_v17, %v202_v19  ;;  %v208_v24 = vsel %vm206_vm7, %v205_v18, %v203_v20 }
  0x3e   : >> { %vm211_vm8 = vcmp.ge.f32.partialorder %v209_v21, %v207_v23  ;;  %v214_v25 = vrot.slane %v209_v21, 1  ;;  %v215_v26 = vrot.slane %v210_v22, 1 }
  0x3f   : >> { %v212_v27 = vsel %vm211_vm8, %v209_v21, %v207_v23  ;;  %v213_v28 = vsel %vm211_vm8, %v210_v22, %v208_v24 }
  0x40   : >> { %vm216_vm9 = vcmp.ge.f32.partialorder %v214_v25, %v212_v27  ;;  %v219_v29 = vrot.slane %v214_v25, 1  ;;  %v220_v30 = vrot.slane %v215_v26, 1 }
  0x41   : >> { %v217_v31 = vsel %vm216_vm9, %v214_v25, %v212_v27  ;;  %v218_v32 = vsel %vm216_vm9, %v215_v26, %v213_v28 }
  0x42   : >> { %vm221_vm10 = vcmp.ge.f32.partialorder %v219_v29, %v217_v31  ;;  %v224_v33 = vrot.slane %v219_v29, 1  ;;  %v225_v34 = vrot.slane %v220_v30, 1 }
  0x43   : >> { %v222_v35 = vsel %vm221_vm10, %v219_v29, %v217_v31  ;;  %v223_v36 = vsel %vm221_vm10, %v220_v30, %v218_v32 }
  0x44   : >> { %vm226_vm11 = vcmp.ge.f32.partialorder %v224_v33, %v222_v35 }
  0x45   : >> { %v228_v37 = vsel %vm226_vm11, %v225_v34, %v223_v36 }
  0x46   : >> { %230 = vrot.lane.b32.xlu0 %v228_v37, %s229_s27  ;;  %s360_s27 = scalar_lea.vmem (%p175_p11), %s894_s1, %s573_s6 }
  0xb8   : >> { %v231_v38 = vpop.permute.xlu0 %230 }
  0xb9   : >> { %578 = vpush %v231_v38 }
  0xea   : >> { %s579_s29 = spop %578 }
  0xeb   : >> { %v237_v41 = vstv %s579_s29  ;;  %s242_s30 = scalar_lea.vmem [#allocation2], %s579_s29  ;;  %s248_s5 = scalar_lea.vmem [#allocation7], %s579_s29 }
  0xec   : >> { %v244_v43 = vld [vmem:[%s242_s30] ss:$0 sm:$0xff]  ;;  %v239_v46 = vsel %vm236_vm12, %v237_v41, %v238_v42 }
  0xed   : >> { %v250_v45 = vld [vmem:[%s248_s5] ss:$0 sm:$0xff]  ;;  %245 = vst [vmem:[%s242_s30] sm:$0x1] %v243_v40  ;;  %vm253_vm13 = vcmp.ne.f32.partialorder %v244_v43, 0.0  ;;  %v260_v62 = vsel %vm259_vm5, %v244_v43, 0.0 }
  0xee   : >> { %246 = vst [vmem:[%s241_s28] sm:$0x1] %v244_v43  ;;  %vm254_vm15 = vmand %vm236_vm12, %vm253_vm13 }
  0xef   : >> { %251 = vst [vmem:[%s248_s5] sm:$0x1] %v249_v44  ;;  %v255_v47 = vsel %vm254_vm15, %v244_v43, 1.0 }
  0xf0   : >> { %252 = vst [vmem:[%s247_s4] sm:$0x1] %v250_v45  ;;  %v268_v48 = vsel %vm267_vm14, %v255_v47, 1.0 }
  0xf1   : >> { %628 = vrcp.f32 %v268_v48  ;;  %240 = vst [vmem:[%s793_s19] sm:$0x1] %v239_v46  ;;  %v280_v52 = vand.u32 2147483648, %v268_v48  ;;  %v278_v54 = vand.u32 2147483647, %v268_v48  ;;  %vm274_vm1 = vweird.f32 %v268_v48  ;;  %s355_s19 = scalar_lea.sflag (%p175_p11), [#allocation6], %s145_s7 }
  0xf3   : >> { %v281_v56 = vor.u32 1.1754944e-38, %v280_v52  ;;  %vm279_vm3 = vcmp.eq.f32.partialorder %v278_v54, 8.507059e+37 }
  0xf5   : >> { %v264_v58 = vld [vmem:[#allocation2] sm:$0xff] }
  0xf7   : >> { %v629_v49 = vpop.eup %628  ;;  %v291_v4 = vld [vmem:[#allocation7] sm:$0xff] (%p175_p11) }
  0xf8   : >> { %v270_v50 = vmul.f32 %v629_v49, %v268_v48  ;;  %vm275_vm0 = vweird.f32 %v629_v49 }
  0xf9   : >> { %vm276_vm2 = vmor %vm274_vm1, %vm275_vm0 }
  0xfa   : >> { %v271_v51 = vsub.f32 1.0, %v270_v50 }
  0xfc   : >> { %v272_v53 = vmul.f32 %v629_v49, %v271_v51 }
  0xfe   : >> { %v273_v55 = vadd.f32 %v629_v49, %v272_v53 }
 0x100   : >> { %v277_v57 = vsel %vm276_vm2, %v629_v49, %v273_v55 }
 0x101   : >> { %v282_v59 = vsel %vm279_vm3, %v281_v56, %v277_v57 }
 0x102   : >> { %v283_v60 = vmul.f32 %v282_v59, %v264_v58 }
 0x104   : >> { %v285_v61 = vsel %vm284_vm4, %v283_v60, 0.0 }
 0x105   : >> { %286 = vadd.xlane.f32.xlu0 %v285_v61 }
 0x12e   : > { %307 = vxpose.xlu0.b32.start.end [1/1] (short) (narrow) (%p175_p11), %v291_v4, 8 }
 0x178   : >> { %v287_v63 = vpop.xlane.xlu0 %286 }
 0x179   : >> { %v288_v0 = vmul.f32 %v287_v63, %v260_v62  ;;  %177 = sbr.rel (!%p175_p11) target bundleno = 42 (0x2a), region = 206 }
 0x17b   : >> { %v289_v3 = vsub.f32 %v283_v60, %v288_v0 }
 0x17d   : >> { %290 = vst [vmem:[#allocation2] sm:$0xff] %v289_v3 }
 0x17e   : > { %s397_s26 = sshrl.u32 (%p761_p5), %s744_s16, 3  ;;  %v428_v1 = vld [vmem:[%s147_s17] sm:$0xff] (%p761_p5) }
 0x17f   : > { %s574_s28 = sshll.u32 (%p761_p5), %s397_s26, 3 }
 0x180   : > { %s399_s4 = scalar_lea.vmem (%p761_p5), %s895_s2, %s574_s28 }
 0x181   : > { %429 = vst [vmem:[%s399_s4] sm:$0xff] (%p761_p5), %v428_v1 }
 0x184   : > { %v342_v5 = vld [vmem:[#allocation2] sm:$0xf] }
 0x185   : > { %345 = vst [vmem:[%s141_s22] sm:$0xf] %v342_v5 }
 0x18c   : > { %v377_v6 = vld [vmem:[%s141_s22] sm:$0xf] }
 0x18d   : > { %378 = vst [vmem:[%s360_s27] sm:$0xf] %v377_v6 }
 0x1cf   : > { %396 = sbr.rel (!%p761_p5) target bundleno = 468 (0x1d4), region = 92 }
 0x1d2   : > { %v323_v7 = vpop.trf.xlu0 }
 0x1d3   : > { %339 = vst [vmem:[%s798_s21] sm:$0x1] %v323_v7 }
 0x1d4 PF: > { %s436_s8 = sshrl.u32 %s744_s16, 3  ;;  %s442_s7 = sshll.u32 %s154_s20, 4  ;;  %s443_s7 = int_to_ptr.vmem [resolvable:$true] %s442_s7 }
 0x1d5   : > { %s575_s21 = sshll.u32 %s436_s8, 3  ;;  %s650_s16 = scalar_lea.hbm %s896_s3, 8 }
 0x1d6   : > { %s440_s6 = scalar_lea.hbm %s896_s3, %s575_s21 }
 0x1d7   : > { %s444_s17 = sshll.u32 %s440_s6, 4  ;;  %s445_s17 = int_to_ptr.hbm [resolvable:$true] %s444_s17 }
 0x1d8   : > { %s644_s10 = sshra.s32 %s445_s17, 4  ;;  %s645_s10 = int_to_ptr.hbm [resolvable:$true] %s644_s10 }
 0x1d9   : > { %s646_s11 = scalar_lea.hbm %s645_s10, 8  ;;  %p651_p1 = scmp.lt.s32.totalorder %s645_s10, %s896_s3 }
 0x1da   : > { %p647_p12 = scmp.ne.s32.totalorder %s645_s10, %s646_s11  ;;  %p652_p2 = scmp.lt.s32.totalorder %s650_s16, %s646_s11 }
 0x1dc   : > { %p648_p13 = pnand %p647_p12, %p761_p5  ;;  %p653_p3 = por %p652_p2, %p651_p1 }
 0x1de   : > { %p649_p0 = pneg %p648_p13 }
 0x1e0   : > { %p654_p4 = pnand %p653_p3, %p649_p0 }
 0x1e2   : > { %657 = shalt.err (!%p654_p4)
}
 0x1e3   : > { %580 = dma.vmem_to_hbm [thread:$0]  (%p761_p5), %s443_s7, 128, %s445_s17, %s355_s19  }
 0x1e4 PF: > { %p586_p7 = scmp.ge.s32.totalorder %s696_s15, 2  ;;  %s467_s28 = sand.u32 1, %s684_s12  }
 0x1e5   : > { %s468_s29 = scalar_lea.sflag [#allocation6], %s467_s28 }
 0x1e6   : > { %p583_p8 = pnand %p586_p7, %p765_p6 }
 0x1e8   : > { %p584_p9 = pneg %p583_p8 }
 0x1ea   : > { %679 = dma.done.wait (%p584_p9), %s468_s29, 128  }
 0x1eb   : > { %681 = vsyncadd (%p584_p9), %s468_s29, 4294967168  ;;  %p10_p10 = scmp.ge.s32.totalorder %s748_s18, 10   ;;  %s899_s12 = smov %s688_s13 }
 0x1ec   : > { %s900_s13 = smov %s692_s14  ;;  %s901_s14 = smov %s759_s23 }
 0x1ed   : > { %s902_s15 = smov %s748_s18  ;;  %12 = sbr.rel (!%p10_p10) target bundleno = 3 (0x3), region = 217 }
 0x1f2   :  { %474 = vsyncpa [#allocation6], 1 }
 0x1f3   :  { %476 = vsyncpa [#allocation6 + $0x1], 1 }

</bundles_post_ra>
